<compile_context>
chip_gen: v5e
topology: v5e:2x2
jax: 0.10.0
libtpu: 0.0.40
codegen_flags: <defaults>
</compile_context>

<pallas_src>
from itertools import groupby

import numpy as np

import jax
import jax.numpy as jnp
from jax.experimental import pallas as pl
from jax.experimental.pallas import tpu as pltpu


def _accuracy_char_kernel(tgt_smem, pred_ref, tgt_ref, out_ref):
    pred = pred_ref[...]                       # [T, C], native dtype (batch squeezed)
    tgt = tgt_ref[...]                         # [1, L] int32
    T, C = pred.shape
    L = tgt.shape[1]

    # --- argmax over classes (torch.max(prediction, dim=1)), first-max index ---
    max_val = jnp.max(pred, axis=1, keepdims=True)                 # [T, 1]
    col = jax.lax.broadcasted_iota(jnp.int32, (T, C), 1)
    max_idx = jnp.min(jnp.where(pred == max_val, col, C),
                      axis=1, keepdims=True)                       # [T, 1] int32

    # --- CTC-style collapse: keep first element of each run, drop class 0 ---
    row = jax.lax.broadcasted_iota(jnp.int32, (T, 1), 0)
    # prev[t] = max_idx[t-1]; the wrap-around at t==0 is masked by (row == 0).
    prev = pltpu.roll(max_idx, shift=1, axis=0)                    # [T, 1]
    changed = jnp.logical_or(max_idx != prev, row == 0)
    keep = jnp.logical_and(changed, max_idx != 0)                  # [T, 1] bool
    keep_i = keep.astype(jnp.int32)

    # --- rank[t] = #kept positions strictly before t (index in collapsed seq) ---
    # Exclusive prefix sum via a log2(T)-step scan of rolls + masked adds.
    inc = keep_i
    shift = 1
    while shift < T:
        rolled = pltpu.roll(inc, shift=shift, axis=0)
        inc = inc + jnp.where(row >= shift, rolled, 0)
        shift *= 2
    rank = inc - keep_i                                            # [T, 1]

    # --- target length: scalar read from SMEM, clipped to L, /0 guarded ---
    len_raw = tgt_smem[0, L - 1]
    len_t = jnp.minimum(len_raw, L)
    denom = jnp.maximum(len_t, 1).astype(jnp.float32)

    # --- matched symbols between collapsed prediction and truncated target ---
    lane = jax.lax.broadcasted_iota(jnp.int32, (T, L), 1)
    match = (keep
             & (rank == lane)
             & (lane < len_t)
             & (max_idx == tgt))                                   # [T, L]
    acc = jnp.sum(match.astype(jnp.float32)) / denom
    out_ref[...] = acc.reshape(1, 1)


def accuracy_char(prediction, target):
    """Pallas equivalent of AccuracyChar.forward. Returns a scalar f32 accuracy."""
    B, T, C = prediction.shape
    L = target.shape[1]
    # Only the (tiny) target row is touched in the wrapper; the big prediction
    # tensor goes into pallas_call untouched (batch squeezed by the BlockSpec).
    tgt_row = target[0].astype(jnp.int32).reshape(1, L)

    grid_spec = pltpu.PrefetchScalarGridSpec(
        num_scalar_prefetch=1,                 # target row -> SMEM (scalar length read)
        grid=(1,),
        in_specs=[
            pl.BlockSpec((None, T, C), lambda i, tgt: (0, 0, 0)),  # batch-0, native dtype
            pl.BlockSpec((1, L), lambda i, tgt: (0, 0)),           # target values in VMEM
        ],
        out_specs=pl.BlockSpec((1, 1), lambda i, tgt: (0, 0)),
    )
    out = pl.pallas_call(
        _accuracy_char_kernel,
        out_shape=jax.ShapeDtypeStruct((1, 1), jnp.float32),
        grid_spec=grid_spec,
        compiler_params=pltpu.CompilerParams(
            dimension_semantics=("arbitrary",)),
    )(tgt_row, prediction, tgt_row)
    return out[0, 0]


def _reference_accuracy(prediction, target):
    """Plain numpy re-implementation of the torch module, for validation."""
    tgt = np.asarray(target[0])
    tgt = tgt[: int(tgt[-1])]
    pred = np.asarray(prediction[0])
    max_index = pred.argmax(axis=1)
    collapsed = [c for c, _ in groupby(max_index.tolist()) if c != 0]
    acc = 0.0
    for idx in range(min(len(tgt), len(collapsed))):
        acc += float(tgt[idx] == collapsed[idx])
    return acc / len(tgt)


if __name__ == "__main__":
    key = jax.random.PRNGKey(0)
    B, T, C, L = 2, 8, 32, 8
    kp, kt = jax.random.split(key)
    prediction = jax.random.normal(kp, (B, T, C), dtype=jnp.float32)
    target = jax.random.randint(kt, (B, L), 1, C, dtype=jnp.int32)
    # encode the valid target length in the last element, as the torch module expects
    target = target.at[:, -1].set(5)

    out = accuracy_char(prediction, target)
    jax.block_until_ready(out)

    ref = _reference_accuracy(np.asarray(prediction), np.asarray(target))
    assert abs(float(out) - ref) < 1e-5, (float(out), ref)
    print("KERNEL_OK")
</pallas_src>

<mosaic_0001>
module attributes {stable_mosaic.version = 11 : i64} {
  func.func @_accuracy_char_kernel(%arg0: i32, %arg1: memref<1x8xi32, #tpu.memory_space<smem>>, %arg2: memref<1x8x32xf32, #tpu.memory_space<vmem>>, %arg3: memref<1x8xi32, #tpu.memory_space<vmem>>, %arg4: memref<1x1xf32, #tpu.memory_space<vmem>>) attributes {dimension_semantics = [#tpu.dimension_semantics<arbitrary>], iteration_bounds = array<i64: 1>, scalar_prefetch = 1 : i64, scratch_operands = 0 : i64, tpu.core_type = #tpu.core_type<tc>, window_params = [{transform_indices = @transform_0, window_bounds = array<i64: 1, 8, 32>}, {pipeline_mode = #tpu.pipeline_mode<synchronous>, transform_indices = @transform_1, window_bounds = array<i64: 1, 8>}, {pipeline_mode = #tpu.pipeline_mode<synchronous>, transform_indices = @transform_2, window_bounds = array<i64: 1, 1>}]} {
    %c0 = arith.constant 0 : index
    %c0_0 = arith.constant 0 : index
    %c0_1 = arith.constant 0 : index
    %0 = vector.load %arg2[%c0, %c0_0, %c0_1] : memref<1x8x32xf32, #tpu.memory_space<vmem>>, vector<1x8x32xf32>
    %1 = vector.shape_cast %0 : vector<1x8x32xf32> to vector<8x32xf32>
    %c0_2 = arith.constant 0 : index
    %c0_3 = arith.constant 0 : index
    %2 = vector.load %arg3[%c0_2, %c0_3] : memref<1x8xi32, #tpu.memory_space<vmem>>, vector<1x8xi32>
    %cst = arith.constant dense<0xFF800000> : vector<8xf32>
    %3 = vector.multi_reduction <maximumf>, %1, %cst [1] : vector<8x32xf32> to vector<8xf32>
    %4 = vector.shape_cast %3 : vector<8xf32> to vector<8x1xf32>
    %5 = tpu.iota {dimensions = array<i32: 1>} : vector<8x32xi32>
    %6 = vector.broadcast %4 : vector<8x1xf32> to vector<8x32xf32>
    %7 = arith.cmpf oeq, %1, %6 : vector<8x32xf32>
    %c32_i32 = arith.constant 32 : i32
    %8 = vector.broadcast %c32_i32 : i32 to vector<8x32xi32>
    %9 = arith.select %7, %5, %8 : vector<8x32xi1>, vector<8x32xi32>
    %cst_4 = arith.constant dense<2147483647> : vector<8xi32>
    %10 = vector.multi_reduction <minsi>, %9, %cst_4 [1] : vector<8x32xi32> to vector<8xi32>
    %11 = vector.shape_cast %10 : vector<8xi32> to vector<8x1xi32>
    %12 = tpu.iota {dimensions = array<i32: 0>} : vector<8x1xi32>
    %c1_i32 = arith.constant 1 : i32
    %13 = tpu.dynamic_rotate %11 by %c1_i32 dim 0 : vector<8x1xi32>, i32 -> vector<8x1xi32>
    %14 = arith.cmpi ne, %11, %13 : vector<8x1xi32>
    %c0_i32 = arith.constant 0 : i32
    %15 = vector.broadcast %c0_i32 : i32 to vector<8x1xi32>
    %16 = arith.cmpi eq, %12, %15 : vector<8x1xi32>
    %17 = arith.ori %14, %16 : vector<8x1xi1>
    %c0_i32_5 = arith.constant 0 : i32
    %18 = vector.broadcast %c0_i32_5 : i32 to vector<8x1xi32>
    %19 = arith.cmpi ne, %11, %18 : vector<8x1xi32>
    %20 = arith.andi %17, %19 : vector<8x1xi1>
    %21 = arith.extui %20 : vector<8x1xi1> to vector<8x1xi32>
    %c1_i32_6 = arith.constant 1 : i32
    %22 = tpu.dynamic_rotate %21 by %c1_i32_6 dim 0 : vector<8x1xi32>, i32 -> vector<8x1xi32>
    %c1_i32_7 = arith.constant 1 : i32
    %23 = vector.broadcast %c1_i32_7 : i32 to vector<8x1xi32>
    %24 = arith.cmpi sge, %12, %23 : vector<8x1xi32>
    %c0_i32_8 = arith.constant 0 : i32
    %25 = vector.broadcast %c0_i32_8 : i32 to vector<8x1xi32>
    %26 = arith.select %24, %22, %25 : vector<8x1xi1>, vector<8x1xi32>
    %27 = arith.addi %21, %26 : vector<8x1xi32>
    %c2_i32 = arith.constant 2 : i32
    %28 = tpu.dynamic_rotate %27 by %c2_i32 dim 0 : vector<8x1xi32>, i32 -> vector<8x1xi32>
    %c2_i32_9 = arith.constant 2 : i32
    %29 = vector.broadcast %c2_i32_9 : i32 to vector<8x1xi32>
    %30 = arith.cmpi sge, %12, %29 : vector<8x1xi32>
    %c0_i32_10 = arith.constant 0 : i32
    %31 = vector.broadcast %c0_i32_10 : i32 to vector<8x1xi32>
    %32 = arith.select %30, %28, %31 : vector<8x1xi1>, vector<8x1xi32>
    %33 = arith.addi %27, %32 : vector<8x1xi32>
    %c4_i32 = arith.constant 4 : i32
    %34 = tpu.dynamic_rotate %33 by %c4_i32 dim 0 : vector<8x1xi32>, i32 -> vector<8x1xi32>
    %c4_i32_11 = arith.constant 4 : i32
    %35 = vector.broadcast %c4_i32_11 : i32 to vector<8x1xi32>
    %36 = arith.cmpi sge, %12, %35 : vector<8x1xi32>
    %c0_i32_12 = arith.constant 0 : i32
    %37 = vector.broadcast %c0_i32_12 : i32 to vector<8x1xi32>
    %38 = arith.select %36, %34, %37 : vector<8x1xi1>, vector<8x1xi32>
    %39 = arith.addi %33, %38 : vector<8x1xi32>
    %40 = arith.subi %39, %21 : vector<8x1xi32>
    %c0_13 = arith.constant 0 : index
    %c7 = arith.constant 7 : index
    %41 = memref.load %arg1[%c0_13, %c7] : memref<1x8xi32, #tpu.memory_space<smem>>
    %c8_i32 = arith.constant 8 : i32
    %42 = arith.minsi %41, %c8_i32 : i32
    %c1_i32_14 = arith.constant 1 : i32
    %43 = arith.maxsi %42, %c1_i32_14 : i32
    %44 = arith.sitofp %43 : i32 to f32
    %45 = tpu.iota {dimensions = array<i32: 1>} : vector<8x8xi32>
    %46 = vector.broadcast %40 : vector<8x1xi32> to vector<8x8xi32>
    %47 = arith.cmpi eq, %46, %45 : vector<8x8xi32>
    %48 = vector.broadcast %20 : vector<8x1xi1> to vector<8x8xi1>
    %49 = arith.andi %48, %47 : vector<8x8xi1>
    %50 = vector.broadcast %42 : i32 to vector<8x8xi32>
    %51 = arith.cmpi slt, %45, %50 : vector<8x8xi32>
    %52 = arith.andi %49, %51 : vector<8x8xi1>
    %53 = vector.broadcast %11 : vector<8x1xi32> to vector<8x8xi32>
    %54 = vector.broadcast %2 : vector<1x8xi32> to vector<8x8xi32>
    %55 = arith.cmpi eq, %53, %54 : vector<8x8xi32>
    %56 = arith.andi %52, %55 : vector<8x8xi1>
    %57 = arith.extui %56 : vector<8x8xi1> to vector<8x8xi32>
    %58 = arith.sitofp %57 : vector<8x8xi32> to vector<8x8xf32>
    %59 = vector.shape_cast %58 : vector<8x8xf32> to vector<1x8x8xf32>
    %cst_15 = arith.constant dense<0.000000e+00> : vector<1xf32>
    %60 = vector.multi_reduction <add>, %59, %cst_15 [1, 2] : vector<1x8x8xf32> to vector<1xf32>
    %61 = vector.shape_cast %60 : vector<1xf32> to vector<1x1x1xf32>
    %62 = vector.extract %61[0, 0, 0] : f32 from vector<1x1x1xf32>
    %63 = arith.divf %62, %44 : f32
    %64 = vector.broadcast %63 : f32 to vector<1x1xf32>
    %c0_16 = arith.constant 0 : index
    %c0_17 = arith.constant 0 : index
    %65 = vector.load %arg4[%c0_16, %c0_17] : memref<1x1xf32, #tpu.memory_space<vmem>>, vector<1x1xf32>
    tpu.vector_store %arg4[%c0_16, %c0_17], %64 {strides = array<i32>} : memref<1x1xf32, #tpu.memory_space<vmem>>, vector<1x1xf32>,
    return
  }
  func.func @transform_0(%arg0: i32, %arg1: memref<1x8xi32, #tpu.memory_space<smem>>) -> (i32, i32, i32) {
    %c0_i32 = arith.constant 0 : i32
    %c0_i32_0 = arith.constant 0 : i32
    %c0_i32_1 = arith.constant 0 : i32
    %c0_i32_2 = arith.constant 0 : i32
    return %c0_i32, %c0_i32_0, %c0_i32_1 : i32, i32, i32
  }
  func.func @transform_1(%arg0: i32, %arg1: memref<1x8xi32, #tpu.memory_space<smem>>) -> (i32, i32) {
    %c0_i32 = arith.constant 0 : i32
    %c0_i32_0 = arith.constant 0 : i32
    %c0_i32_1 = arith.constant 0 : i32
    return %c0_i32, %c0_i32_0 : i32, i32
  }
  func.func @transform_2(%arg0: i32, %arg1: memref<1x8xi32, #tpu.memory_space<smem>>) -> (i32, i32) {
    %c0_i32 = arith.constant 0 : i32
    %c0_i32_0 = arith.constant 0 : i32
    %c0_i32_1 = arith.constant 0 : i32
    return %c0_i32, %c0_i32_0 : i32, i32
  }
}

</mosaic_0001>

<bundles_post_ra>
// kernel: tpu_custom_call.1
= control target key start
LH: loop header
LB: loop body
LE: loop exit
PB: predicated region body
PF: predicated region fallthrough
CT: control target
= control target key end

     0   :  { %s243_s15 = smov [#allocation3]   ;;  %s280_s0 = inlined_call_operand.hbm [shape: s32[1,8], index: 0, kind: input, shape index: {}]   ;;  %s281_s1 = inlined_call_operand.hbm [shape: f32[2,8,32], index: 1, kind: input, shape index: {}]   ;;  %s282_s2 = inlined_call_operand.vmem [shape: s32[1,8], index: 2, kind: input, shape index: {}]   ;;  %s283_s3 = inlined_call_operand.hbm [shape: f32[1,1], index: 3, kind: output, shape index: {}]  }
   0x1   :  { %s9_s14 = sshll.u32 %s280_s0, 4  ;;  %s10_s14 = int_to_ptr.hbm [resolvable:$true] %s9_s14 }
   0x2   :  { %12 = dma.hbm_to_smem %s10_s14, 16, %s243_s15, [#allocation2] }
   0x3   :  { %237 = dma.done.wait [#allocation2], 16 }
   0x4   :  { %238 = vsyncadd [#allocation2], 4294967280 }
   0x5   :  { %15 = sfence }
   0x6   :  { %16 = vsyncpa [#allocation5], 0 }
   0x7   :  { %17 = vsyncpa [#allocation6], 0  ;;  %s23_s18 = sshll.u32 %s281_s1, 4  ;;  %s244_s19 = smov [#allocation4]   ;;  %s24_s18 = int_to_ptr.hbm [resolvable:$true] %s23_s18 }
   0x8   :  { %s25_s20 = sshll.u32 %s244_s19, 4  ;;  %s26_s20 = int_to_ptr.vmem [resolvable:$true] %s25_s20 }
   0x9   :  { %28 = dma.hbm_to_vmem [thread:$0]  %s24_s18, 128, %s26_s20, [#allocation5]  }
   0xa   :  { %239 = dma.done.wait [#allocation5], 128  }
   0xb   :  { %240 = vsyncadd [#allocation5], 4294967168  ;;  %vm37_vm0 = vcmask 261120   ;;  %v35_v0 = vld [vmem:[#allocation4] sm:$0xff]  ;;  %v41_v2 = vlaneseq  ;;  %v245_v13 = vmov 0   ;;  %s153_s0 = sld [smem:[#allocation3 + $0x7]] }
   0xc   :  { %v38_v1 = vsel %vm37_vm0, %v35_v0, -inf  ;;  %172 = vset.pattern.permute.xlu2 %v245_v13  ;;  %171 = vset.pattern.permute.xlu1 %v245_v13  ;;  %v174_v34 = vld [vmem:[%s282_s2] ss:$0 sm:$0xff]  ;;  %v246_v36 = vmov 0.0   ;;  %s247_s2 = smov [#allocation7]   ;;  %s143_s28 = sshll.u32 %s283_s3, 4  ;;  %s144_s28 = int_to_ptr.hbm [resolvable:$true] %s143_s28 }
   0xd   :  { %39 = vmax.xlane.f32.xlu0 %v38_v1  ;;  %v42_v3 = vand.u32 127, %v41_v2  ;;  %v61_v16 = vshrl.u32 %v41_v2, 7  ;;  %s141_s24 = sshll.u32 %s247_s2, 4  ;;  %s142_s24 = int_to_ptr.vmem [resolvable:$true] %s141_s24 }
   0xe   :  { %173 = vset.pattern.permute.xlu0 %v245_v13 }
   0xf   :  { %vm64_vm3 = vcmp.eq.s32.totalorder %v61_v16, 0  ;;  %vm70_vm8 = vcmp.ge.s32.totalorder %v61_v16, 1  ;;  %vm74_vm9 = vcmp.ge.s32.totalorder %v61_v16, 2  ;;  %vm78_vm10 = vcmp.ge.s32.totalorder %v61_v16, 4 }
  0x11   :  { %p83_p0 = scmp.lt.s32.totalorder %s153_s0, 8  ;;  %p154_p1 = scmp.gt.s32.totalorder %s153_s0, 1 }
  0x13   :  { %s84_s1 = scalar_select %p83_p0, %s153_s0, 8 }
  0x15   :  { %v97_v32 = vstv %s84_s1  ;;  %s285_s1 = smov (!%p154_p1, %s84_s1), 1 }
  0x16   :  { %vm98_vm11 = vcmp.lt.s32.totalorder %v42_v3, %v97_v32  ;;  %s87_s23 = scvt.s32.f32 %s285_s1 }
  0x18   :  { %v116_v39 = vstv %s87_s23 }
  0x19   :  { %175 = vrcp.f32 %v116_v39  ;;  %v128_v47 = vand.u32 2147483648, %v116_v39  ;;  %v126_v49 = vand.u32 2147483647, %v116_v39 }
  0x1b   :  { %v129_v52 = vor.u32 1.1754944e-38, %v128_v47 }
  0x1f   :  { %v176_v40 = vpop.eup %175 }
  0x20   :  { %v118_v41 = vmul.f32 %v176_v40, %v116_v39 }
  0x22   :  { %v119_v42 = vsub.f32 1.0, %v118_v41 }
  0x24   :  { %v120_v44 = vmul.f32 %v176_v40, %v119_v42 }
  0x26   :  { %v121_v48 = vadd.f32 %v176_v40, %v120_v44 }
  0x80   :  { %v40_v4 = vpop.xlane.xlu0 %39 }
  0x81   :  { %vm43_vm1 = vcmp.eq.f32.partialorder %v35_v0, %v40_v4 }
  0x82   :  { %v44_v5 = vsel %vm43_vm1, %v42_v3, 32  ;;  %vm105_vm1 = vcmask 64512  }
  0x83   :  { %v45_v6 = vsel %vm37_vm0, %v44_v5, 2147483647 }
  0x84   :  { %v47_v7 = vshra.s32 %v45_v6, 16  ;;  %v46_v9 = vand.u32 65535, %v45_v6 }
  0x86   :  { %v49_v8 = vcvt.s32.f32 %v47_v7  ;;  %v48_v11 = vcvt.s32.f32 %v46_v9 }
  0x88   :  { %50 = vmin.xlane.f32.xlu0 %v49_v8 }
  0xfb   :  { %v51_v10 = vpop.xlane.xlu0 %50 }
  0xfc   :  { %vm52_vm2 = vcmp.eq.f32.partialorder %v49_v8, %v51_v10  ;;  %v57_v14 = vcvt.f32.s32 %v51_v10 }
  0xfd   :  { %v53_v12 = vsel %vm52_vm2, %v48_v11, inf }
  0xfe   :  { %54 = vmin.xlane.f32.xlu1 %v53_v12  ;;  %v58_v17 = vshll.u32 %v57_v14, 16 }
 0x171   :  { %v55_v15 = vpop.xlane.xlu1 %54 }
 0x172   :  { %v56_v18 = vcvt.f32.s32 %v55_v15 }
 0x174   :  { %v59_v19 = vadd.s32 %v58_v17, %v56_v18 }
 0x176   :  { %v62_v20 = vrot.slane %v59_v19, 7  ;;  %vm66_vm6 = vcmp.ne.s32.totalorder %v59_v19, 0  ;;  %vm101_vm0 = vcmp.eq.s32.totalorder %v59_v19, %v174_v34 }
 0x178   :  { %vm63_vm4 = vcmp.ne.s32.totalorder %v59_v19, %v62_v20 }
 0x179   :  { %vm65_vm5 = vmor %vm63_vm4, %vm64_vm3  ;;  %vm122_vm3 = vweird.f32 %v116_v39  ;;  %vm123_vm4 = vweird.f32 %v176_v40 }
 0x17a   :  { %vm67_vm7 = vmand %vm65_vm5, %vm66_vm6  ;;  %vm127_vm6 = vcmp.eq.f32.partialorder %v126_v49, 8.507059e+37 }
 0x17b   :  { %v68_v21 = vsel %vm67_vm7, 1, %v245_v13  ;;  %vm124_vm5 = vmor %vm122_vm3, %vm123_vm4  ;;  %vm134_vm7 = vcmask 0  }
 0x17c   :  { %93 = vperm.xlu2 %172, %v68_v21   ;;  %v69_v22 = vrot.slane %v68_v21, 7  ;;  %v125_v53 = vsel %vm124_vm5, %v176_v40, %v121_v48 }
 0x17d   :  { %v130_v56 = vsel %vm127_vm6, %v129_v52, %v125_v53 }
 0x17e   :  { %v71_v23 = vsel %vm70_vm8, %v69_v22, 0 }
 0x17f   :  { %v72_v24 = vadd.s32 %v71_v23, %v68_v21 }
 0x181   :  { %v73_v25 = vrot.slane %v72_v24, 6 }
 0x183   :  { %v75_v26 = vsel %vm74_vm9, %v73_v25, 0 }
 0x184   :  { %v76_v27 = vadd.s32 %v75_v26, %v72_v24 }
 0x186   :  { %v77_v28 = vrot.slane %v76_v27, 4 }
 0x188   :  { %v79_v29 = vsel %vm78_vm10, %v77_v28, 0 }
 0x189   :  { %v80_v30 = vadd.s32 %v79_v29, %v76_v27 }
 0x18b   :  { %v81_v31 = vsub.s32 %v80_v30, %v68_v21 }
 0x18d   :  { %89 = vperm.xlu1 %171, %v81_v31  }
 0x1d6   :  { %v94_v33 = vpop.permute.xlu2 %93 }
 0x1d7   :  { %vm95_vm12 = vcmp.eq.s32.totalorder %v94_v33, 1 }
 0x1ff   :  { %v90_v35 = vpop.permute.xlu1 %89 }
 0x200   :  { %vm91_vm13 = vcmp.eq.s32.totalorder %v90_v35, %v42_v3 }
 0x201   :  { %vm96_vm14 = vmand %vm95_vm12, %vm91_vm13 }
 0x202   :  { %vm99_vm15 = vmand %vm96_vm14, %vm98_vm11 }
 0x203   :  { %vm102_vm2 = vmand %vm99_vm15, %vm101_vm0 }
 0x204   :  { %v159_v37 = vsel %vm102_vm2, 1.0, %v246_v36 }
 0x205   :  { %v106_v38 = vsel %vm105_vm1, %v159_v37, 0.0 }
 0x206   :  { %107 = vadd.xlane.f32.xlu2 %v106_v38 }
 0x279   :  { %v108_v43 = vpop.xlane.xlu2 %107 }
 0x27a   :  { %v109_v45 = vrot.slane %v108_v43, 4 }
 0x27c   :  { %v110_v46 = vadd.f32 %v109_v45, %v108_v43 }
 0x27e   :  { %v111_v50 = vrot.slane %v110_v46, 2 }
 0x280   :  { %v112_v51 = vadd.f32 %v111_v50, %v110_v46 }
 0x282   :  { %v113_v54 = vrot.slane %v112_v51, 1 }
 0x284   :  { %v114_v55 = vadd.f32 %v113_v54, %v112_v51 }
 0x286   :  { %162 = vpush %v114_v55 }
 0x287   :  { %164 = vpush %v130_v56 }
 0x2b7   :  { %s163_s25 = spop %162 }
 0x2b8   :  { %s165_s29 = spop %164 }
 0x2b9   :  { %s132_s30 = smul.f32 %s165_s29, %s163_s25 }
 0x2bb   :  { %v133_v57 = vstv %s132_s30 }
 0x2bc   :  { %135 = vst.msk [vmem:[#allocation7] sm:$0x1] %vm134_vm7, %v133_v57 }
 0x2bd   :  { %146 = dma.vmem_to_hbm [thread:$0]  %s142_s24, 16, %s144_s28, [#allocation6]  }
 0x2be   :  { %241 = dma.done.wait [#allocation6], 16  }
 0x2bf   :  { %242 = vsyncadd [#allocation6], 4294967280 }
 0x2c0   :  { %151 = vsyncpa [#allocation5], 1 }
 0x2c1   :  { %152 = vsyncpa [#allocation6], 1 }

</bundles_post_ra>
